<compile_context>
chip_gen: v7x
topology: tpu7x:2x2x1
jax: 0.10.0
libtpu: 0.0.40
codegen_flags: <defaults>
</compile_context>

<pallas_src>
import math

import jax
import jax.numpy as jnp
from jax import lax
from jax.experimental import pallas as pl
from jax.experimental.pallas import tpu as pltpu

# ---------------- small config consistent with the module ----------------
B = 2            # batch
N = 8            # graph nodes (adj is N x N)
C_IN = 12        # gcn in_channel (== out_channel, required by the `x + inp` residual)
C_HID = 32       # gcn hidden_channel
C_OUT = 12       # gcn out_channel
N_CLUSTERS = 4   # args.n_clusters
Y_LEN = 12       # args.y_len
MAPPING = (1, 3, 5, 6)           # predicted node indices (static)
N_PRED = len(MAPPING)
OUT_W = Y_LEN + N_CLUSTERS       # merged output lane width
INV_D = 1.0 / math.sqrt(C_OUT)   # 1 / sqrt(out_channel)


# ---------------- the fused PECPM forward kernel (one grid step = one batch) ----------------
def pecpm_kernel(x_ref, adj_ref, w1_ref, b1_ref, w2_ref, b2_ref, badj_ref,
                 wc_ref, wm_ref, bm_ref, out_ref):
    x = x_ref[...]                                        # (N, C_IN) f32 (residual stream)
    xb = x.astype(jnp.bfloat16)
    adj = adj_ref[...]                                    # (N, N) bf16

    # ---- GCN1: neighbor+self fused into a single matmul, then ReLU ----
    ax = jnp.dot(adj, xb, preferred_element_type=jnp.float32)              # adj @ x
    cat1 = jnp.concatenate([ax.astype(jnp.bfloat16), xb], axis=-1)         # (N, 2*C_IN)
    h1 = jnp.dot(cat1, w1_ref[...], preferred_element_type=jnp.float32) + b1_ref[...]
    h1 = jnp.maximum(h1, 0.0).astype(jnp.bfloat16)                         # (N, C_HID)

    # ---- Conv1d(1->1, k=3, pad=1) is pre-folded into w2/b2/badj (see prepare()) ----
    # ---- GCN2: neighbor+self fused, + folded conv biases, + encoder residual ----
    ah = jnp.dot(adj, h1, preferred_element_type=jnp.float32)              # adj @ t  (folded)
    cat2 = jnp.concatenate([ah.astype(jnp.bfloat16), h1], axis=-1)         # (N, 2*C_HID)
    h2 = (jnp.dot(cat2, w2_ref[...], preferred_element_type=jnp.float32)
          + b2_ref[...] + badj_ref[...])                                    # (N, C_OUT)
    z = h2 + x                                                              # + inp residual

    # ---- cluster soft-assignment: softmax(z @ w.T / sqrt(out_channel)) ----
    s = lax.dot_general(z.astype(jnp.bfloat16), wc_ref[...],
                        (((1,), (1,)), ((), ())),
                        preferred_element_type=jnp.float32) * INV_D         # (N, K)
    s = s - jnp.max(s, axis=-1, keepdims=True)
    p = jnp.exp(s)
    p = p / jnp.sum(p, axis=-1, keepdims=True)                              # exact softmax

    # ---- cluster readout + ReLU + MLP head (run on ALL rows; select in wrapper) ----
    h = jnp.dot(p.astype(jnp.bfloat16), wc_ref[...], preferred_element_type=jnp.float32)
    o = jnp.maximum(h + z, 0.0)                                             # args.activation=='relu'
    y = (jnp.dot(o.astype(jnp.bfloat16), wm_ref[...], preferred_element_type=jnp.float32)
         + bm_ref[...])                                                     # (N, Y_LEN)

    # ---- single lane-contiguous output slab: [mlp_out | loglilike] ----
    out_ref[...] = jnp.concatenate([y, p], axis=-1)                         # (N, Y_LEN + K)


# ---------------- once-per-model constant folding (NOT on the per-call path) ----------------
def prepare(params, adj):
    adj = adj.astype(jnp.float32)

    # Conv1d taps -> tridiagonal map T (t = h1 @ T + bt), then fold T into GCN2 weights:
    #   [adj@t, t] @ [Wn2; Ws2]
    #     = [adj@h1, h1] @ [T@Wn2; T@Ws2] + bt*rowsum(adj)[:,None]*colsum(Wn2) + bt*colsum(Ws2)
    kw = params["tcn_w"].astype(jnp.float32)                     # (3,)
    bt = params["tcn_b"].astype(jnp.float32)[0]                  # scalar
    T = (kw[0] * jnp.eye(C_HID, k=1, dtype=jnp.float32)
         + kw[1] * jnp.eye(C_HID, k=0, dtype=jnp.float32)
         + kw[2] * jnp.eye(C_HID, k=-1, dtype=jnp.float32))

    wn2 = params["gcn2_wn"].astype(jnp.float32)                  # (C_HID, C_OUT)
    ws2 = params["gcn2_ws"].astype(jnp.float32)
    w2_fused = jnp.concatenate([T @ wn2, T @ ws2], axis=0)       # (2*C_HID, C_OUT)
    b2 = params["gcn2_bn"].astype(jnp.float32) + bt * jnp.sum(ws2, axis=0, keepdims=True)
    badj = (bt * jnp.sum(adj, axis=1))[:, None] * jnp.sum(wn2, axis=0)[None, :]  # (N, C_OUT)

    w1_fused = jnp.concatenate([params["gcn1_wn"], params["gcn1_ws"]], axis=0)   # (2*C_IN, C_HID)

    return dict(
        adj=adj.astype(jnp.bfloat16),
        w1=w1_fused.astype(jnp.bfloat16),
        b1=params["gcn1_bn"].astype(jnp.float32),
        w2=w2_fused.astype(jnp.bfloat16),
        b2=b2.astype(jnp.float32),
        badj=badj.astype(jnp.float32),
        wc=params["w_clusters"].astype(jnp.bfloat16),
        wm=params["mlp_w"].astype(jnp.bfloat16),
        bm=params["mlp_b"].astype(jnp.float32),
    )


# ---------------- hot-path wrapper: one pallas_call + static row select ----------------
def pecpm_forward(inp, prep, mapping):
    """inp: (B, N, C_IN) -> (out (B, N_PRED*Y_LEN), loglilike (B, N_PRED, N_CLUSTERS))."""
    x = inp.astype(jnp.float32)

    slab = pl.pallas_call(
        pecpm_kernel,
        out_shape=jax.ShapeDtypeStruct((B, N, OUT_W), jnp.float32),
        grid=(B,),
        in_specs=[
            pl.BlockSpec((None, N, C_IN), lambda b: (b, 0, 0)),      # x      (per-batch block)
            pl.BlockSpec((N, N), lambda b: (0, 0)),                  # adj    (resident)
            pl.BlockSpec((2 * C_IN, C_HID), lambda b: (0, 0)),       # w1 fused
            pl.BlockSpec((1, C_HID), lambda b: (0, 0)),              # b1
            pl.BlockSpec((2 * C_HID, C_OUT), lambda b: (0, 0)),      # w2 fused (conv folded)
            pl.BlockSpec((1, C_OUT), lambda b: (0, 0)),              # b2 (incl. conv bias)
            pl.BlockSpec((N, C_OUT), lambda b: (0, 0)),              # adj-rowsum conv bias
            pl.BlockSpec((N_CLUSTERS, C_OUT), lambda b: (0, 0)),     # w_clusters
            pl.BlockSpec((C_OUT, Y_LEN), lambda b: (0, 0)),          # mlp_w
            pl.BlockSpec((1, Y_LEN), lambda b: (0, 0)),              # mlp_b
        ],
        out_specs=pl.BlockSpec((None, N, OUT_W), lambda b: (b, 0, 0)),
        compiler_params=pltpu.CompilerParams(
            dimension_semantics=("parallel",)),                      # shards batch over v7x's 2 TCs
    )(x, prep["adj"], prep["w1"], prep["b1"], prep["w2"], prep["b2"],
      prep["badj"], prep["wc"], prep["wm"], prep["bm"])

    idx = jnp.asarray(mapping, jnp.int32)                            # static indices
    sel = jnp.take(slab, idx, axis=1)                                # (B, N_PRED, OUT_W)
    out = sel[..., :Y_LEN].reshape(-1, len(mapping) * Y_LEN)         # (B, N_PRED*Y_LEN)
    loglilike = sel[..., Y_LEN:]                                     # (B, N_PRED, K)
    return out, loglilike


# ---------------- deterministic parameter init (PyTorch-style uniform fan-in) ----------------
def init_params(key):
    ks = jax.random.split(key, 10)

    def lin_w(k, fan_in, fan_out):
        bound = 1.0 / math.sqrt(fan_in)
        # stored (in, out) so the kernel does x @ W  (== PyTorch x @ W.T)
        return jax.random.uniform(k, (fan_in, fan_out), jnp.float32, -bound, bound)

    def lin_b(k, fan_in, fan_out):
        bound = 1.0 / math.sqrt(fan_in)
        return jax.random.uniform(k, (1, fan_out), jnp.float32, -bound, bound)

    conv_bound = 1.0 / math.sqrt(1 * 3)
    return {
        "gcn1_wn": lin_w(ks[0], C_IN, C_HID),
        "gcn1_bn": lin_b(ks[1], C_IN, C_HID),
        "gcn1_ws": lin_w(ks[2], C_IN, C_HID),
        "tcn_w": jax.random.uniform(ks[3], (3,), jnp.float32, -conv_bound, conv_bound),
        "tcn_b": jax.random.uniform(ks[4], (1,), jnp.float32, -conv_bound, conv_bound),
        "gcn2_wn": lin_w(ks[5], C_HID, C_OUT),
        "gcn2_bn": lin_b(ks[6], C_HID, C_OUT),
        "gcn2_ws": lin_w(ks[7], C_HID, C_OUT),
        # nn.init.kaiming_uniform_(w, a=sqrt(5)) on (K, C_OUT): bound = 1/sqrt(C_OUT)
        "w_clusters": jax.random.uniform(ks[8], (N_CLUSTERS, C_OUT), jnp.float32,
                                         -1.0 / math.sqrt(C_OUT), 1.0 / math.sqrt(C_OUT)),
        "mlp_w": lin_w(ks[9], C_OUT, Y_LEN),
        "mlp_b": jnp.zeros((1, Y_LEN), jnp.float32),
    }


if __name__ == "__main__":
    key = jax.random.PRNGKey(0)
    k_inp, k_adj, k_p = jax.random.split(key, 3)
    inp = jax.random.normal(k_inp, (B, N, C_IN), dtype=jnp.float32)
    adj = jax.random.uniform(k_adj, (N, N), dtype=jnp.float32) / N
    params = init_params(k_p)

    # once-per-model constant folding (kept off the per-call hot path)
    prep = jax.block_until_ready(prepare(params, adj))

    fwd = jax.jit(lambda inp, prep: pecpm_forward(inp, prep, MAPPING))
    out, ll = fwd(inp, prep)
    out, ll = jax.block_until_ready((out, ll))

    assert out.shape == (B, N_PRED * Y_LEN), out.shape
    assert ll.shape == (B, N_PRED, N_CLUSTERS), ll.shape
    assert bool(jnp.all(jnp.isfinite(out))) and bool(jnp.all(jnp.isfinite(ll)))
    # loglilike rows are a softmax -> must sum to 1
    assert bool(jnp.allclose(jnp.sum(ll, axis=-1), 1.0, atol=1e-3))
    print("KERNEL_OK")
</pallas_src>

<mosaic_0001>
module attributes {stable_mosaic.version = 11 : i64} {
  func.func @pecpm_kernel(%arg0: i32, %arg1: memref<1x8x12xf32, #tpu.memory_space<vmem>>, %arg2: memref<8x8xbf16, #tpu.memory_space<vmem>>, %arg3: memref<24x32xbf16, #tpu.memory_space<vmem>>, %arg4: memref<1x32xf32, #tpu.memory_space<vmem>>, %arg5: memref<64x12xbf16, #tpu.memory_space<vmem>>, %arg6: memref<1x12xf32, #tpu.memory_space<vmem>>, %arg7: memref<8x12xf32, #tpu.memory_space<vmem>>, %arg8: memref<4x12xbf16, #tpu.memory_space<vmem>>, %arg9: memref<12x12xbf16, #tpu.memory_space<vmem>>, %arg10: memref<1x12xf32, #tpu.memory_space<vmem>>, %arg11: memref<1x8x16xf32, #tpu.memory_space<vmem>>) attributes {dimension_semantics = [#tpu.dimension_semantics<parallel>], iteration_bounds = array<i64: 2>, scalar_prefetch = 0 : i64, scratch_operands = 0 : i64, tpu.core_type = #tpu.core_type<tc>, window_params = [{transform_indices = @transform_0, window_bounds = array<i64: 1, 8, 12>}, {pipeline_mode = #tpu.pipeline_mode<synchronous>, transform_indices = @transform_1, window_bounds = array<i64: 8, 8>}, {pipeline_mode = #tpu.pipeline_mode<synchronous>, transform_indices = @transform_2, window_bounds = array<i64: 24, 32>}, {pipeline_mode = #tpu.pipeline_mode<synchronous>, transform_indices = @transform_3, window_bounds = array<i64: 1, 32>}, {pipeline_mode = #tpu.pipeline_mode<synchronous>, transform_indices = @transform_4, window_bounds = array<i64: 64, 12>}, {pipeline_mode = #tpu.pipeline_mode<synchronous>, transform_indices = @transform_5, window_bounds = array<i64: 1, 12>}, {pipeline_mode = #tpu.pipeline_mode<synchronous>, transform_indices = @transform_6, window_bounds = array<i64: 8, 12>}, {pipeline_mode = #tpu.pipeline_mode<synchronous>, transform_indices = @transform_7, window_bounds = array<i64: 4, 12>}, {pipeline_mode = #tpu.pipeline_mode<synchronous>, transform_indices = @transform_8, window_bounds = array<i64: 12, 12>}, {pipeline_mode = #tpu.pipeline_mode<synchronous>, transform_indices = @transform_9, window_bounds = array<i64: 1, 12>}, {transform_indices = @transform_10, window_bounds = array<i64: 1, 8, 16>}]} {
    %c0 = arith.constant 0 : index
    %c0_0 = arith.constant 0 : index
    %c0_1 = arith.constant 0 : index
    %0 = vector.load %arg1[%c0, %c0_0, %c0_1] : memref<1x8x12xf32, #tpu.memory_space<vmem>>, vector<1x8x12xf32>
    %1 = vector.shape_cast %0 : vector<1x8x12xf32> to vector<8x12xf32>
    %2 = arith.truncf %1 : vector<8x12xf32> to vector<8x12xbf16>
    %c0_2 = arith.constant 0 : index
    %c0_3 = arith.constant 0 : index
    %3 = vector.load %arg2[%c0_2, %c0_3] : memref<8x8xbf16, #tpu.memory_space<vmem>>, vector<8x8xbf16>
    %cst = arith.constant dense<0.000000e+00> : vector<8x12xf32>
    %4 = tpu.matmul %3, %2, %cst {dimension_numbers = #tpu.dot_dimension_numbers<[1], [0], [0], [1], [0, 0, 1, 1], [], []>} : vector<8x8xbf16>, vector<8x12xbf16>, vector<8x12xf32> -> vector<8x12xf32>
    %5 = arith.truncf %4 : vector<8x12xf32> to vector<8x12xbf16>
    %6 = tpu.concatenate %5, %2 in 1 : vector<8x12xbf16>, vector<8x12xbf16> -> vector<8x24xbf16>
    %c0_4 = arith.constant 0 : index
    %c0_5 = arith.constant 0 : index
    %7 = vector.load %arg3[%c0_4, %c0_5] : memref<24x32xbf16, #tpu.memory_space<vmem>>, vector<24x32xbf16>
    %cst_6 = arith.constant dense<0.000000e+00> : vector<8x32xf32>
    %8 = tpu.matmul %6, %7, %cst_6 {dimension_numbers = #tpu.dot_dimension_numbers<[1], [0], [0], [1], [0, 0, 1, 1], [], []>} : vector<8x24xbf16>, vector<24x32xbf16>, vector<8x32xf32> -> vector<8x32xf32>
    %c0_7 = arith.constant 0 : index
    %c0_8 = arith.constant 0 : index
    %9 = vector.load %arg4[%c0_7, %c0_8] : memref<1x32xf32, #tpu.memory_space<vmem>>, vector<1x32xf32>
    %10 = vector.broadcast %9 : vector<1x32xf32> to vector<8x32xf32>
    %11 = arith.addf %8, %10 : vector<8x32xf32>
    %cst_9 = arith.constant 0.000000e+00 : f32
    %12 = vector.broadcast %cst_9 : f32 to vector<8x32xf32>
    %13 = arith.maximumf %11, %12 : vector<8x32xf32>
    %14 = arith.truncf %13 : vector<8x32xf32> to vector<8x32xbf16>
    %cst_10 = arith.constant dense<0.000000e+00> : vector<8x32xf32>
    %15 = tpu.matmul %3, %14, %cst_10 {dimension_numbers = #tpu.dot_dimension_numbers<[1], [0], [0], [1], [0, 0, 1, 1], [], []>} : vector<8x8xbf16>, vector<8x32xbf16>, vector<8x32xf32> -> vector<8x32xf32>
    %16 = arith.truncf %15 : vector<8x32xf32> to vector<8x32xbf16>
    %17 = tpu.concatenate %16, %14 in 1 : vector<8x32xbf16>, vector<8x32xbf16> -> vector<8x64xbf16>
    %c0_11 = arith.constant 0 : index
    %c0_12 = arith.constant 0 : index
    %18 = vector.load %arg5[%c0_11, %c0_12] : memref<64x12xbf16, #tpu.memory_space<vmem>>, vector<64x12xbf16>
    %cst_13 = arith.constant dense<0.000000e+00> : vector<8x12xf32>
    %19 = tpu.matmul %17, %18, %cst_13 {dimension_numbers = #tpu.dot_dimension_numbers<[1], [0], [0], [1], [0, 0, 1, 1], [], []>} : vector<8x64xbf16>, vector<64x12xbf16>, vector<8x12xf32> -> vector<8x12xf32>
    %c0_14 = arith.constant 0 : index
    %c0_15 = arith.constant 0 : index
    %20 = vector.load %arg6[%c0_14, %c0_15] : memref<1x12xf32, #tpu.memory_space<vmem>>, vector<1x12xf32>
    %21 = vector.broadcast %20 : vector<1x12xf32> to vector<8x12xf32>
    %22 = arith.addf %19, %21 : vector<8x12xf32>
    %c0_16 = arith.constant 0 : index
    %c0_17 = arith.constant 0 : index
    %23 = vector.load %arg7[%c0_16, %c0_17] : memref<8x12xf32, #tpu.memory_space<vmem>>, vector<8x12xf32>
    %24 = arith.addf %22, %23 : vector<8x12xf32>
    %25 = arith.addf %24, %1 : vector<8x12xf32>
    %26 = arith.truncf %25 : vector<8x12xf32> to vector<8x12xbf16>
    %c0_18 = arith.constant 0 : index
    %c0_19 = arith.constant 0 : index
    %27 = vector.load %arg8[%c0_18, %c0_19] : memref<4x12xbf16, #tpu.memory_space<vmem>>, vector<4x12xbf16>
    %cst_20 = arith.constant dense<0.000000e+00> : vector<8x4xf32>
    %28 = tpu.matmul %26, %27, %cst_20 {dimension_numbers = #tpu.dot_dimension_numbers<[1], [1], [0], [0], [0, 0, 1, 0], [], []>} : vector<8x12xbf16>, vector<4x12xbf16>, vector<8x4xf32> -> vector<8x4xf32>
    %cst_21 = arith.constant 0.288675129 : f32
    %29 = vector.broadcast %cst_21 : f32 to vector<8x4xf32>
    %30 = arith.mulf %28, %29 : vector<8x4xf32>
    %cst_22 = arith.constant dense<0xFF800000> : vector<8xf32>
    %31 = vector.multi_reduction <maximumf>, %30, %cst_22 [1] : vector<8x4xf32> to vector<8xf32>
    %32 = vector.shape_cast %31 : vector<8xf32> to vector<8x1xf32>
    %33 = vector.broadcast %32 : vector<8x1xf32> to vector<8x4xf32>
    %34 = arith.subf %30, %33 : vector<8x4xf32>
    %35 = math.exp %34 : vector<8x4xf32>
    %cst_23 = arith.constant dense<0.000000e+00> : vector<8xf32>
    %36 = vector.multi_reduction <add>, %35, %cst_23 [1] : vector<8x4xf32> to vector<8xf32>
    %37 = vector.shape_cast %36 : vector<8xf32> to vector<8x1xf32>
    %38 = vector.broadcast %37 : vector<8x1xf32> to vector<8x4xf32>
    %39 = arith.divf %35, %38 : vector<8x4xf32>
    %40 = arith.truncf %39 : vector<8x4xf32> to vector<8x4xbf16>
    %c0_24 = arith.constant 0 : index
    %c0_25 = arith.constant 0 : index
    %41 = vector.load %arg8[%c0_24, %c0_25] : memref<4x12xbf16, #tpu.memory_space<vmem>>, vector<4x12xbf16>
    %cst_26 = arith.constant dense<0.000000e+00> : vector<8x12xf32>
    %42 = tpu.matmul %40, %41, %cst_26 {dimension_numbers = #tpu.dot_dimension_numbers<[1], [0], [0], [1], [0, 0, 1, 1], [], []>} : vector<8x4xbf16>, vector<4x12xbf16>, vector<8x12xf32> -> vector<8x12xf32>
    %43 = arith.addf %42, %25 : vector<8x12xf32>
    %cst_27 = arith.constant 0.000000e+00 : f32
    %44 = vector.broadcast %cst_27 : f32 to vector<8x12xf32>
    %45 = arith.maximumf %43, %44 : vector<8x12xf32>
    %46 = arith.truncf %45 : vector<8x12xf32> to vector<8x12xbf16>
    %c0_28 = arith.constant 0 : index
    %c0_29 = arith.constant 0 : index
    %47 = vector.load %arg9[%c0_28, %c0_29] : memref<12x12xbf16, #tpu.memory_space<vmem>>, vector<12x12xbf16>
    %cst_30 = arith.constant dense<0.000000e+00> : vector<8x12xf32>
    %48 = tpu.matmul %46, %47, %cst_30 {dimension_numbers = #tpu.dot_dimension_numbers<[1], [0], [0], [1], [0, 0, 1, 1], [], []>} : vector<8x12xbf16>, vector<12x12xbf16>, vector<8x12xf32> -> vector<8x12xf32>
    %c0_31 = arith.constant 0 : index
    %c0_32 = arith.constant 0 : index
    %49 = vector.load %arg10[%c0_31, %c0_32] : memref<1x12xf32, #tpu.memory_space<vmem>>, vector<1x12xf32>
    %50 = vector.broadcast %49 : vector<1x12xf32> to vector<8x12xf32>
    %51 = arith.addf %48, %50 : vector<8x12xf32>
    %52 = tpu.concatenate %51, %39 in 1 : vector<8x12xf32>, vector<8x4xf32> -> vector<8x16xf32>
    %c0_33 = arith.constant 0 : index
    %c0_34 = arith.constant 0 : index
    %c0_35 = arith.constant 0 : index
    %53 = vector.load %arg11[%c0_33, %c0_34, %c0_35] : memref<1x8x16xf32, #tpu.memory_space<vmem>>, vector<1x8x16xf32>
    %54 = vector.shape_cast %53 : vector<1x8x16xf32> to vector<8x16xf32>
    %55 = vector.shape_cast %52 : vector<8x16xf32> to vector<1x8x16xf32>
    tpu.vector_store %arg11[%c0_33, %c0_34, %c0_35], %55 {strides = array<i32>} : memref<1x8x16xf32, #tpu.memory_space<vmem>>, vector<1x8x16xf32>,
    return
  }
  func.func @transform_0(%arg0: i32) -> (i32, i32, i32) {
    %c0_i32 = arith.constant 0 : i32
    %c0_i32_0 = arith.constant 0 : i32
    %c0_i32_1 = arith.constant 0 : i32
    return %arg0, %c0_i32, %c0_i32_0 : i32, i32, i32
  }
  func.func @transform_1(%arg0: i32) -> (i32, i32) {
    %c0_i32 = arith.constant 0 : i32
    %c0_i32_0 = arith.constant 0 : i32
    %c0_i32_1 = arith.constant 0 : i32
    return %c0_i32, %c0_i32_0 : i32, i32
  }
  func.func @transform_2(%arg0: i32) -> (i32, i32) {
    %c0_i32 = arith.constant 0 : i32
    %c0_i32_0 = arith.constant 0 : i32
    %c0_i32_1 = arith.constant 0 : i32
    return %c0_i32, %c0_i32_0 : i32, i32
  }
  func.func @transform_3(%arg0: i32) -> (i32, i32) {
    %c0_i32 = arith.constant 0 : i32
    %c0_i32_0 = arith.constant 0 : i32
    %c0_i32_1 = arith.constant 0 : i32
    return %c0_i32, %c0_i32_0 : i32, i32
  }
  func.func @transform_4(%arg0: i32) -> (i32, i32) {
    %c0_i32 = arith.constant 0 : i32
    %c0_i32_0 = arith.constant 0 : i32
    %c0_i32_1 = arith.constant 0 : i32
    return %c0_i32, %c0_i32_0 : i32, i32
  }
  func.func @transform_5(%arg0: i32) -> (i32, i32) {
    %c0_i32 = arith.constant 0 : i32
    %c0_i32_0 = arith.constant 0 : i32
    %c0_i32_1 = arith.constant 0 : i32
    return %c0_i32, %c0_i32_0 : i32, i32
  }
  func.func @transform_6(%arg0: i32) -> (i32, i32) {
    %c0_i32 = arith.constant 0 : i32
    %c0_i32_0 = arith.constant 0 : i32
    %c0_i32_1 = arith.constant 0 : i32
    return %c0_i32, %c0_i32_0 : i32, i32
  }
  func.func @transform_7(%arg0: i32) -> (i32, i32) {
    %c0_i32 = arith.constant 0 : i32
    %c0_i32_0 = arith.constant 0 : i32
    %c0_i32_1 = arith.constant 0 : i32
    return %c0_i32, %c0_i32_0 : i32, i32
  }
  func.func @transform_8(%arg0: i32) -> (i32, i32) {
    %c0_i32 = arith.constant 0 : i32
    %c0_i32_0 = arith.constant 0 : i32
    %c0_i32_1 = arith.constant 0 : i32
    return %c0_i32, %c0_i32_0 : i32, i32
  }
  func.func @transform_9(%arg0: i32) -> (i32, i32) {
    %c0_i32 = arith.constant 0 : i32
    %c0_i32_0 = arith.constant 0 : i32
    %c0_i32_1 = arith.constant 0 : i32
    return %c0_i32, %c0_i32_0 : i32, i32
  }
  func.func @transform_10(%arg0: i32) -> (i32, i32, i32) {
    %c0_i32 = arith.constant 0 : i32
    %c0_i32_0 = arith.constant 0 : i32
    %c0_i32_1 = arith.constant 0 : i32
    return %arg0, %c0_i32, %c0_i32_0 : i32, i32, i32
  }
}

</mosaic_0001>

<bundles_post_ra>
// kernel: _lambda_.1
= control target key start
LH: loop header
LB: loop body
LE: loop exit
PB: predicated region body
PF: predicated region fallthrough
CT: control target
= control target key end

     0   :  { %15 = vsyncpa [#allocation3], 0  ;;  %s1110_s13 = smov 0   ;;  %s1254_s0 = inlined_call_operand.vmem [shape: f32[2,8,12], index: 0, kind: input, shape index: {}]   ;;  %s1255_s1 = inlined_call_operand.vmem [shape: bf16[8,8], index: 1, kind: input, shape index: {}]   ;;  %s1256_s2 = inlined_call_operand.vmem [shape: bf16[24,32], index: 2, kind: input, shape index: {}]   ;;  %s1257_s3 = inlined_call_operand.vmem [shape: f32[1,32], index: 3, kind: input, shape index: {}]   ;;  %s1258_s4 = inlined_call_operand.vmem [shape: bf16[64,12], index: 4, kind: input, shape index: {}]   ;;  %s1259_s5 = inlined_call_operand.vmem [shape: f32[1,12], index: 5, kind: input, shape index: {}]   ;;  %s1260_s6 = inlined_call_operand.vmem [shape: f32[8,12], index: 6, kind: input, shape index: {}]   ;;  %s1261_s7 = inlined_call_operand.vmem [shape: bf16[4,12], index: 7, kind: input, shape index: {}]   ;;  %s1262_s8 = inlined_call_operand.hbm [shape: bf16[12,12], index: 8, kind: input, shape index: {}]   ;;  %s1263_s9 = inlined_call_operand.vmem [shape: f32[1,12], index: 9, kind: input, shape index: {}]   ;;  %s1264_s10 = inlined_call_operand.vmem [shape: f32[2,8,16], index: 10, kind: output, shape index: {}]  }
   0x1 LB: > { %s1116_s14 = sadd.s32 4294967295, %s1046_s13   ;;  %p878_p0 = scmp.ge.s32.totalorder %s1046_s13, 1  ;;  %s1046_s13 = sphi %s1110_s13, %s21_s13  }
   0x2   : > { %p267_p1 = scmp.lt.s32.totalorder %s1046_s13, 3  ;;  %s1048_s15 = smov [#allocation2]  }
   0x3   : > { %s300_s16 = sshll.u32 %s1048_s15, 4  ;;  %p1265_p3 = scmp.eq.s32.totalorder %s1116_s14, 0  ;;  %s301_s16 = int_to_ptr.vmem [resolvable:$true] %s300_s16 }
   0x4   : > { %p1120_p2 = pnand %p878_p0, %p267_p1  ;;  %s1008_s21 = scalar_lea.hbm %s1262_s8, 128 }
   0x5   : > { %p1009_p6 = scmp.ne.s32.totalorder %s1262_s8, %s1008_s21  ;;  %p1015_p10 = scmp.lt.u32.totalorder %s1008_s21, %s1262_s8 }
   0x6   : > { %s1267_s17 = scalar_select %p1120_p2, 1, 0 }
   0x7   : > { %p976_p4 = pneg %p1120_p2 }
   0x9   : > { %p1129_p5 = pnand %p1265_p3, %p976_p4 }
   0xb   : > { %p1010_p7 = pneg %p1129_p5 }
   0xd   : > { %p1011_p8 = pnand %p1010_p7, %p1009_p6 }
   0xf   : > { %p1012_p9 = pneg %p1011_p8 }
  0x11   : > { %p1017_p11 = pnand %p1015_p10, %p1012_p9 }
  0x13   : > { %1020 = shalt.err (!%p1017_p11)
}
  0x14   : > { %s1021_s26 = scalar_lea.vmem %s301_s16, 128  ;;  %p1029_p1 = scmp.lt.s32.totalorder %s301_s16, %s301_s16 }
  0x15   : > { %p1022_p12 = scmp.ne.s32.totalorder %s301_s16, %s1021_s26  ;;  %p1030_p4 = scmp.lt.s32.totalorder %s1021_s26, %s1021_s26 }
  0x17   : > { %p1024_p13 = pnand %p1022_p12, %p1010_p7  ;;  %p1031_p3 = por %p1030_p4, %p1029_p1 }
  0x19   : > { %p1025_p0 = pneg %p1024_p13 }
  0x1b   : > { %p1032_p2 = pnand %p1031_p3, %p1025_p0 }
  0x1d   : > { %1035 = shalt.err (!%p1032_p2)
}
  0x1e   : > { %s1049_s27 = smov 64   ;;  %s1050_s28 = smov 4  }
  0x1f   : > { %979 = dma.hbm_to_vmem [thread:$0]  (!%p1129_p5), %s1262_s8, 128, %s301_s16, [#allocation3], %s1049_s27, %s1049_s27, %s1050_s28  }
  0x20   : > { %p1269_p6 = scmp.ne.s32.totalorder %s1267_s17, 0 }
  0x21   : > { %p1270_p8 = scmp.eq.s32.totalorder (!%p1269_p6), %s1116_s14, 0 }
  0x22   : > { %326 = sbr.rel (%p1269_p6) target bundleno = 1890 (0x762), region = 60 }
  0x29   : > { %1041 = dma.done.wait (%p1270_p8), [#allocation3], 128   ;;  %p1271_p7 = pmov %p1270_p8 }
  0x2a   : > { %p362_p2 = scmp.lt.s32.totalorder %s1116_s14, 1  ;;  %v1051_v0 = vmov 0.0   ;;  %vm1052_vm0 = vmmov 0   ;;  %vm378_vm1 = vcmask 1043456   ;;  %v997_v3 = vld [vmem:[%s1256_s2] sm:$0xff]   ;;  %vm374_vm2 = vcmask 64512  }
  0x2b   : > { %1043 = vsyncadd (%p1271_p7), [#allocation3], 4294967168  ;;  %922 = vmatprep.subr.bf16.mxu0 %v1051_v0  ;;  %924 = vmatprep.mubr.msk.bf16.mxu0 %vm1052_vm0, %v1051_v0  ;;  %v373_v4 = vld [vmem:[%s1255_s1] sm:$0xf]  ;;  %s1053_s21 = smov 12   ;;  %vm426_vm3 = vcmask 97280  }
  0x2c   : > { %s1273_s14 = smov (!%p362_p2, %s1116_s14), 1  ;;  %928 = vmatprep.subr.bf16.mxu1 %v1051_v0  ;;  %932 = vmatprep.mubr.msk.bf16.mxu1 %vm1052_vm0, %v1051_v0  ;;  %v998_v6 = vld [vmem:[%s1256_s2 + $0x8] ss:$0 sps:$4 sm:$0xff]   ;;  %vm449_vm4 = vcmask 195584   ;;  %v999_v15 = vld [vmem:[%s1258_s4] sm:$0xff]   ;;  %v1001_v18 = vld [vmem:[%s1258_s4 + $0x10] sm:$0xff]  }
  0x2d   : > { %s883_s11 = sshll.u32 %s1273_s14, 3  ;;  %929 = vmatpush3.bf16.msra.mxu1 %v997_v3  ;;  %v453_v7 = vsel %vm378_vm1, %v998_v6, 0  ;;  %v1000_v16 = vld [vmem:[%s1258_s4 + $0x8] sm:$0xff]   ;;  %v886_v17 = vld [vmem:[%s1257_s3] ss:$0 sm:$0xff]  ;;  %s1054_s15 = smov 32  }
  0x2e   : > { %s365_s16 = scalar_lea.vmem %s1254_s0, %s883_s11  ;;  %930 = vmatprep.subr.bf16.mxu1 %v1051_v0  ;;  %v1002_v27 = vld [vmem:[%s1258_s4 + $0x18] sm:$0xff]   ;;  %vm544_vm5 = vcmask 261120   ;;  %vm587_vm6 = vcmask 523264   ;;  %v634_v35 = vld [vmem:[%s1261_s7] sm:$0x3]  ;;  %vm682_vm7 = vcmask 31744   ;;  %s369_s28 = scalar_lea.vmem %s1264_s10, %s883_s11 }
  0x2f   : > { %v1171_v1 = vld [vmem:[%s365_s16] sm:$0xff]  ;;  %v639_v36 = vsel %vm426_vm3, %v634_v35, 0  ;;  %vm698_vm8 = vcmask 1041408   ;;  %vm760_vm9 = vcmask 1045504   ;;  %vm809_vm10 = vcmask 130048  }
  0x30   : > { %v372_v2 = vpack.c.bf16 %v1171_v1, %v1171_v1  ;;  %v891_v37 = vld [vmem:[%s1259_s5] ss:$0 sm:$0xff]  ;;  %v699_v58 = vsel %vm698_vm8, %v634_v35, 0 }
  0x31   : > { %931 = vmatpush3.bf16.msra.mxu1 %v453_v7  ;;  %v630_v39 = vld [vmem:[%s1260_s6] sm:$0xff] }
  0x32   : > { %v380_v5 = vsel %vm378_vm1, %v372_v2, 0  ;;  %424 = vrot.lane.b32.xlu0 %v372_v2, %s1053_s21  ;;  %942 = vmatprep.subr.bf16.mxu1 %v1051_v0  ;;  %v1003_v63 = vld [vmem:[#allocation2] sm:$0x3f]  }
  0x33   : > { %923 = vmatpush3.bf16.msra.mxu0 %v380_v5 }
  0x34   : > { %936 = vmatprep.subr.bf16.mxu0 %v1051_v0 }
  0x36   : > { %925 = vmatmul.mubr.msk.bf16.vlgmr.msra.gmra.mrb[0].mxu0 %vm374_vm2, %v373_v4 }
  0x37   : > { %938 = vmatprep.mubr.msk.bf16.mxu0 %vm1052_vm0, %v1051_v0 }
  0xa4   : > { %v425_v9 = vpop.permute.xlu0 %424 }
 0x109   : > { %v416_v8 = vpop.f32.mrb[0].mxu0 }
 0x10a   : > { %v422_v10 = vpack.c.bf16 %v416_v8, %v416_v8  ;;  %v926_v11 = vpop.f32.mrb[1].mxu0  ;;  %v899_v8 = vld [vmem:[%s1263_s9] ss:$0 sm:$0xff] }
 0x10b   : > { %v419_v12 = vpop.f32.mrb[2].mxu0 }
 0x10c   : > { %v429_v13 = vsel %vm426_vm3, %v422_v10, %v425_v9  ;;  %v927_v14 = vpop.f32.mrb[3].mxu0 }
 0x10d   : > { %933 = vmatmul.mubr.msk.bf16.vlgmr.msra.gmra.mrb[0].mxu1 %vm449_vm4, %v429_v13 }
 0x10e   : > { %950 = vmatprep.mubr.msk.bf16.mxu1 %vm1052_vm0, %v1051_v0  ;;  %943 = vmatpush3.bf16.msra.mxu1 %v999_v15 }
 0x10f   : > { %944 = vmatprep.subr.bf16.mxu1 %v1051_v0 }
 0x112   : > { %945 = vmatpush3.bf16.msra.mxu1 %v1000_v16 }
 0x113   : > { %946 = vmatprep.subr.bf16.mxu1 %v1051_v0 }
 0x116   : > { %947 = vmatpush3.bf16.msra.mxu1 %v1001_v18 }
 0x117   : > { %948 = vmatprep.subr.bf16.mxu1 %v1051_v0 }
 0x11a   : > { %949 = vmatpush3.bf16.msra.mxu1 %v1002_v27 }
 0x11b   : > { %966 = vmatprep.subr.bf16.mxu1 %v1051_v0 }
 0x1e0   : > { %v489_v19 = vpop.f32.mrb[0].mxu1 }
 0x1e1   : > { %v490_v20 = vadd.f32 %v886_v17, %v489_v19  ;;  %v934_v21 = vpop.f32.mrb[1].mxu1 }
 0x1e2   : > { %v492_v22 = vpop.f32.mrb[2].mxu1 }
 0x1e3   : > { %v495_v23 = vmax.f32 %v490_v20, 0.0  ;;  %v935_v24 = vpop.f32.mrb[3].mxu1 }
 0x1e5   : > { %v496_v25 = vpack.c.bf16 %v495_v23, %v495_v23 }
 0x1e7   : > { %542 = vrot.lane.b32.xlu0 %v496_v25, %s1054_s15  ;;  %v498_v26 = vsel %vm378_vm1, %v496_v25, 0 }
 0x1e8   : > { %937 = vmatpush3.bf16.msra.mxu0 %v498_v26 }
 0x1e9   : > { %954 = vmatprep.subr.bf16.mxu0 %v1051_v0 }
 0x1eb   : > { %939 = vmatmul.mubr.msk.bf16.vlgmr.msra.gmra.mrb[4].mxu0 %vm374_vm2, %v373_v4 }
 0x1ec   : > { %956 = vmatprep.mubr.msk.bf16.mxu0 %vm1052_vm0, %v1051_v0 }
 0x1f1   : > { %955 = vmatpush3.bf16.xpose.msra.mxu0 %v639_v36 }
 0x1f2   : > { %960 = vmatprep.subr.bf16.mxu0 %v1051_v0 }
 0x259   : > { %v543_v31 = vpop.permute.xlu0 %542 }
 0x2be   : > { %v534_v28 = vpop.f32.mrb[4].mxu0 }
 0x2bf   : > { %v540_v29 = vpack.c.bf16 %v534_v28, %v534_v28  ;;  %v940_v30 = vpop.f32.mrb[5].mxu0 }
 0x2c0   : > { %v537_v32 = vpop.f32.mrb[6].mxu0 }
 0x2c1   : > { %v547_v33 = vsel %vm544_vm5, %v540_v29, %v543_v31  ;;  %v941_v34 = vpop.f32.mrb[7].mxu0 }
 0x2c2   : > { %951 = vmatmul.mubr.msk.bf16.vlgmr.msra.gmra.mrb[4].mxu1 %vm587_vm6, %v547_v33 }
 0x2c3   : > { %968 = vmatprep.mubr.msk.bf16.mxu1 %vm1052_vm0, %v1051_v0 }
 0x395   : > { %v624_v38 = vpop.f32.mrb[4].mxu1 }
 0x396   : > { %v625_v40 = vadd.f32 %v891_v37, %v624_v38  ;;  %v952_v41 = vpop.f32.mrb[5].mxu1 }
 0x397   : > { %v627_v42 = vpop.f32.mrb[6].mxu1 }
 0x398   : > { %v631_v43 = vadd.f32 %v630_v39, %v625_v40  ;;  %v953_v44 = vpop.f32.mrb[7].mxu1 }
 0x39a   : > { %v632_v45 = vadd.f32 %v631_v43, %v1171_v1 }
 0x39c   : > { %v633_v46 = vpack.c.bf16 %v632_v45, %v632_v45 }
 0x39e   : > { %957 = vmatmul.mubr.msk.bf16.vlgmr.msra.gmra.mrb[8].mxu0 %vm426_vm3, %v633_v46 }
 0x39f   : > { %962 = vmatprep.mubr.msk.bf16.mxu0 %vm1052_vm0, %v1051_v0  ;;  %961 = vmatpush3.bf16.msra.mxu0 %v699_v58  ;;  %v762_v0 = vsel %vm760_vm9, %v1003_v63, 0 }
 0x3a0   : > { %967 = vmatpush3.bf16.msra.mxu1 %v762_v0 }
 0x471   : > { %v675_v47 = vpop.f32.mrb[8].mxu0 }
 0x472   : > { %v681_v48 = vmul.f32 0.28867513, %v675_v47  ;;  %v958_v49 = vpop.f32.mrb[9].mxu0 }
 0x473   : > { %v678_v50 = vpop.f32.mrb[10].mxu0 }
 0x474   : > { %v959_v51 = vpop.f32.mrb[11].mxu0  ;;  %v683_v52 = vsel %vm682_vm7, %v681_v48, -inf }
 0x475   : > { %684 = vmax.xlane.f32.xlu1 %v683_v52 }
 0x502   : > { %v685_v53 = vpop.xlane.xlu1 %684 }
 0x503   : > { %v686_v54 = vsub.f32 %v681_v48, %v685_v53 }
 0x505   : > { %v687_v55 = vmul.f32 1.442695, %v686_v54 }
 0x507   : > { %1004 = vpow2.f32 %v687_v55 }
 0x511   : > { %v1005_v56 = vpop.eup %1004 }
 0x512   : > { %v689_v57 = vsel %vm682_vm7, %v1005_v56, 0.0 }
 0x513   : > { %690 = vadd.xlane.f32.xlu1 %v689_v57 }
 0x5a0   : > { %v691_v59 = vpop.xlane.xlu1 %690 }
 0x5a1   : > { %1006 = vrcp.f32 %v691_v59 }
 0x5ab   : > { %v1007_v60 = vpop.eup %1006 }
 0x5ac   : > { %v693_v61 = vmul.f32 %v1007_v60, %v1005_v56 }
 0x5ae   : > { %805 = vrot.lane.b32.xlu0 %v693_v61, %s1053_s21  ;;  %v694_v62 = vpack.c.bf16 %v693_v61, %v693_v61 }
 0x5b0   : > { %963 = vmatmul.mubr.msk.bf16.vlgmr.msra.gmra.mrb[12].mxu0 %vm682_vm7, %v694_v62 }
 0x620   : > { %v806_v12 = vpop.permute.xlu0 %805 }
 0x683   : > { %v735_v1 = vpop.f32.mrb[12].mxu0 }
 0x684   : > { %v736_v2 = vadd.f32 %v735_v1, %v632_v45  ;;  %v964_v3 = vpop.f32.mrb[13].mxu0 }
 0x685   : > { %v738_v4 = vpop.f32.mrb[14].mxu0 }
 0x686   : > { %v741_v5 = vmax.f32 %v736_v2, 0.0  ;;  %v965_v6 = vpop.f32.mrb[15].mxu0 }
 0x688   : > { %v742_v7 = vpack.c.bf16 %v741_v5, %v741_v5 }
 0x68a   : > { %969 = vmatmul.mubr.msk.bf16.vlgmr.msra.gmra.mrb[8].mxu1 %vm426_vm3, %v742_v7 }
 0x75d   : > { %v798_v9 = vpop.f32.mrb[8].mxu1 }
 0x75e   : > { %v799_v10 = vadd.f32 %v899_v8, %v798_v9  ;;  %v970_v11 = vpop.f32.mrb[9].mxu1 }
 0x75f   : > { %v801_v13 = vpop.f32.mrb[10].mxu1 }
 0x760   : > { %v808_v14 = vsel %vm426_vm3, %v799_v10, %v806_v12  ;;  %v971_v15 = vpop.f32.mrb[11].mxu1 }
 0x761   : > { %810 = vst.msk [vmem:[%s369_s28] sm:$0xff] %vm809_vm10, %v808_v14 }
 0x762 PF: > { %s21_s13 = sadd.s32 1, %s1046_s13  }
 0x763   : > { %p18_p3 = scmp.ge.s32.totalorder %s21_s13, 4  }
 0x765   :  { %20 = sbr.rel (!%p18_p3) target bundleno = 1 (0x1), region = 95 }
 0x76c   :  { %830 = vsyncpa [#allocation3], 1 }
 0x76d   :  { %832 = vsyncpa [#allocation3 + $0x1], 1 }

</bundles_post_ra>
